<compile_context>
chip_gen: v6e
topology: v6e:2x2x1
jax: 0.10.0
libtpu: 0.0.40
codegen_flags: <defaults>
</compile_context>

<pallas_src>
import functools

import jax
import jax.numpy as jnp
from jax import lax
from jax.experimental import pallas as pl
from jax.experimental.pallas import tpu as pltpu


_TARGET_TILE_BYTES = 2 << 20      # ~2 MiB per input tile -> ~85%+ of HBM roofline
_VMEM_BUDGET_BYTES = 22 << 20     # estimated working-set budget (under the limit below)
_VMEM_LIMIT_BYTES = 28 << 20      # safe on v5e/v6e (128 MiB) and v7x (64 MiB physical)
_MAX_TILE_ROWS = 4096             # bounds (tb,1) lane-padded temporaries for tiny D
_RESIDENT_LABEL_MAX_BYTES = 2 << 20


def _round_up(x, m):
    return ((x + m - 1) // m) * m


def _pick_chunk(d):
    """Lane-chunk for the D reduction (multiple of 128, else whole row)."""
    if d <= 512:
        return d, 1
    for c in (512, 256, 128):
        if d % c == 0:
            return c, d // c
    return d, 1


def _pick_tile_rows(b, d, itemsize, chunk_d, max_tile_rows=None):
    """Byte-sized batch tile, rounded to the dtype sublane pack, VMEM-budgeted."""
    pack = max(8, 32 // itemsize)          # 8 rows f32, 16 bf16, 32 int8/fp8
    row_bytes = d * itemsize

    tb = max(pack, (_TARGET_TILE_BYTES // row_bytes) // pack * pack)
    tb = min(tb, _MAX_TILE_ROWS)
    if max_tile_rows is not None:
        tb = min(tb, max(pack, _round_up(max_tile_rows, pack)))
    tb = min(tb, _round_up(b, pack))
    tb = max(tb, pack)

    def working_set(rows):
        in_bufs = 2 * 2 * rows * row_bytes            # 2 inputs x 2 pipeline buffers
        temps = 4 * rows * max(chunk_d, 128) * 4      # f32 chunk copies + products
        vecs = 8 * rows * 128 * 4                     # (rows,1) f32 temps, lane padded
        return in_bufs + temps + vecs

    while tb > pack and working_set(tb) > _VMEM_BUDGET_BYTES:
        tb = max(pack, ((tb // 2) // pack) * pack)

    # Whole batch fits in one tile -> use the exact extent (always a legal block).
    if tb >= b:
        tb = b
    return tb


def _contrastive_loss_kernel(p_ref, z_ref, lab_ref, out_ref, *,
                             margin, eps, total_b, tile_b,
                             tiles_total, tiles_per_slice,
                             chunk_d, n_chunks, need_mask, labels_resident):
    i = pl.program_id(1)                   # reduction (batch-tile) axis
    c = pl.program_id(0)                   # core-slice axis (v7x: one per TC)

    # Init this slice's resident accumulator on its first grid step.
    @pl.when(i == 0)
    def _():
        out_ref[...] = jnp.zeros_like(out_ref)

    tile_global = c * tiles_per_slice + i  # unclamped: used for row masking

    # --- reductions over D (chunked so f32 temps stay small) -----------------
    if n_chunks == 1:
        p = p_ref[...].astype(jnp.float32)
        z = z_ref[...].astype(jnp.float32)
        dot = jnp.sum(p * z, axis=-1, keepdims=True)
        pp = jnp.sum(p * p, axis=-1, keepdims=True)
        zz = jnp.sum(z * z, axis=-1, keepdims=True)
    else:
        def body(k, carry):
            dot_a, pp_a, zz_a = carry
            s = pl.multiple_of(k * chunk_d, 128)
            pc = p_ref[:, pl.ds(s, chunk_d)].astype(jnp.float32)
            zc = z_ref[:, pl.ds(s, chunk_d)].astype(jnp.float32)
            dot_a = dot_a + jnp.sum(pc * zc, axis=-1, keepdims=True)
            pp_a = pp_a + jnp.sum(pc * pc, axis=-1, keepdims=True)
            zz_a = zz_a + jnp.sum(zc * zc, axis=-1, keepdims=True)
            return dot_a, pp_a, zz_a

        zero = jnp.zeros((tile_b, 1), jnp.float32)
        dot, pp, zz = lax.fori_loop(0, n_chunks, body, (zero, zero, zero),
                                    unroll=True)

    # 1 / max(||p||*||z||, eps) == rsqrt(max(||p||^2 * ||z||^2, eps^2))  (EUP)
    inv_norms = lax.rsqrt(jnp.maximum(pp * zz, jnp.float32(eps * eps)))
    cos_distance = 1.0 - dot * inv_norms                     # (tb, 1)

    # --- labels ---------------------------------------------------------------
    if labels_resident:
        if tiles_total == 1:
            lab = lab_ref[...].astype(jnp.float32)
        else:
            t_clamped = jnp.minimum(tile_global, tiles_total - 1)
            start = pl.multiple_of(t_clamped * tile_b, 8)
            lab = lab_ref[pl.ds(start, tile_b), :].astype(jnp.float32)
    else:
        lab = lab_ref[...].astype(jnp.float32)

    pos_term = (1.0 - lab) * cos_distance * cos_distance
    hinge = jnp.maximum(jnp.float32(margin) - cos_distance, 0.0)
    neg_term = lab * hinge * hinge * hinge
    per_example = pos_term + neg_term                        # (tb, 1)

    # Mask padded / duplicated rows only when statically required.  Keep it a
    # select (not a multiply) so garbage NaN/Inf rows cannot propagate.
    if need_mask:
        row = lax.broadcasted_iota(jnp.int32, per_example.shape, 0)
        valid = (tile_global * tile_b + row) < total_b
        per_example = jnp.where(valid, per_example, 0.0)

    out_ref[...] += jnp.sum(per_example)


def contrastive_loss(output1, output2, label, margin=2.0, eps=1e-8,
                     max_tile_rows=None):
    """Pallas implementation of ContrastiveLoss.forward (returns a scalar)."""
    assert output1.shape == output2.shape
    assert output1.dtype == output2.dtype
    b, d = output1.shape
    itemsize = jnp.dtype(output1.dtype).itemsize

    chunk_d, n_chunks = _pick_chunk(d)
    tb = _pick_tile_rows(b, d, itemsize, chunk_d, max_tile_rows)

    tiles_total = pl.cdiv(b, tb)
    num_slices = 2 if tiles_total >= 2 else 1       # v7x: one slice per TensorCore
    tiles_per_slice = pl.cdiv(tiles_total, num_slices)
    need_mask = (tiles_total * tb != b) or (num_slices * tiles_per_slice != tiles_total)

    def in_map(c, i):
        # Clamp so the (possibly) extra step of the last slice re-reads a valid
        # tile; its rows are masked out in-kernel via the unclamped index.
        return (jnp.minimum(c * tiles_per_slice + i, tiles_total - 1), 0)

    # Labels: resident full-extent VMEM block for moderate B (no per-step DMA,
    # no (tb,128)-padded double buffer); tiled fallback for huge B.
    label2d = label.reshape(b, 1)
    b_pad = tiles_total * tb
    labels_resident = (b_pad * 128 * 4) <= _RESIDENT_LABEL_MAX_BYTES
    if labels_resident:
        if b_pad != b:
            label2d = jnp.pad(label2d, ((0, b_pad - b), (0, 0)))
        lab_spec = pl.BlockSpec((b_pad, 1), lambda c, i: (0, 0))
    else:
        lab_spec = pl.BlockSpec((tb, 1), in_map)

    kernel = functools.partial(
        _contrastive_loss_kernel,
        margin=float(margin), eps=float(eps),
        total_b=b, tile_b=tb,
        tiles_total=tiles_total, tiles_per_slice=tiles_per_slice,
        chunk_d=chunk_d, n_chunks=n_chunks,
        need_mask=need_mask, labels_resident=labels_resident,
    )

    lab_itemsize = jnp.dtype(label2d.dtype).itemsize
    cost = pl.CostEstimate(
        flops=int(8 * b * d),
        transcendentals=int(b),
        bytes_accessed=int(2 * b * d * itemsize + b * lab_itemsize + num_slices * 4),
    )

    out = pl.pallas_call(
        kernel,
        out_shape=jax.ShapeDtypeStruct((num_slices, 1, 1), jnp.float32),
        grid=(num_slices, tiles_per_slice),
        in_specs=[
            pl.BlockSpec((tb, d), in_map),   # output1 tile
            pl.BlockSpec((tb, d), in_map),   # output2 tile
            lab_spec,                        # labels (resident or tiled)
        ],
        # One resident (1,1,1) accumulator per core-slice, constant across the
        # reduction axis.
        out_specs=pl.BlockSpec((1, 1, 1), lambda c, i: (c, 0, 0)),
        compiler_params=pltpu.CompilerParams(
            dimension_semantics=("parallel", "arbitrary"),
            vmem_limit_bytes=_VMEM_LIMIT_BYTES,
        ),
        cost_estimate=cost,
    )(output1, output2, label2d)

    return jnp.sum(out) / jnp.float32(b)


def _reference_loss(output1, output2, label, margin=2.0, eps=1e-8):
    """Pure-JAX reference (mirrors the PyTorch forward)."""
    o1 = output1.astype(jnp.float32)
    o2 = output2.astype(jnp.float32)
    lab = label.astype(jnp.float32)
    dot = jnp.sum(o1 * o2, axis=-1)
    n1 = jnp.linalg.norm(o1, axis=-1)
    n2 = jnp.linalg.norm(o2, axis=-1)
    cos_sim = dot / jnp.maximum(n1 * n2, eps)
    dist = 1.0 - cos_sim
    return jnp.mean(
        (1.0 - lab) * dist**2 + lab * jnp.maximum(margin - dist, 0.0) ** 3
    )


if __name__ == "__main__":
    base_key = jax.random.PRNGKey(0)

    def run_case(b, d, dtype, max_tile_rows=None, tol=1e-5):
        k1, k2, k3 = jax.random.split(jax.random.fold_in(base_key, b * 131 + d), 3)
        o1 = jax.random.normal(k1, (b, d), dtype=jnp.float32).astype(dtype)
        o2 = jax.random.normal(k2, (b, d), dtype=jnp.float32).astype(dtype)
        lab = jax.random.bernoulli(k3, p=0.5, shape=(b,)).astype(jnp.float32)
        got = contrastive_loss(o1, o2, lab, margin=2.0, max_tile_rows=max_tile_rows)
        got = jax.block_until_ready(got)
        ref = _reference_loss(o1, o2, lab, margin=2.0)
        assert jnp.allclose(got, ref, rtol=tol, atol=tol), (b, d, dtype, got, ref)

    # Single full-batch tile (the small shape implied by the module).
    run_case(8, 32, jnp.float32)
    # Single tile, B not a multiple of the sublane pack.
    run_case(20, 32, jnp.float32)
    # Forced multi-tile: 2 core-slices, clamped duplicate tile, D chunking (1024 = 2x512).
    run_case(24, 1024, jnp.float32, max_tile_rows=8)
    # bf16 inputs (16-row sublane pack), ragged last tile, 2 core-slices.
    run_case(36, 256, jnp.bfloat16, max_tile_rows=16, tol=1e-2)
    # Large-B path: tiled (non-resident) labels, byte-sized tiles, masking.
    run_case(4104, 32, jnp.float32)

    print("KERNEL_OK")
</pallas_src>

<mosaic_0001>
module attributes {stable_mosaic.version = 11 : i64} {
  func.func @_contrastive_loss_kernel(%arg0: i32, %arg1: i32, %arg2: memref<8x32xf32, #tpu.memory_space<vmem>>, %arg3: memref<8x32xf32, #tpu.memory_space<vmem>>, %arg4: memref<8x1xf32, #tpu.memory_space<vmem>>, %arg5: memref<1x1x1xf32, #tpu.memory_space<vmem>>) attributes {dimension_semantics = [#tpu.dimension_semantics<parallel>, #tpu.dimension_semantics<arbitrary>], iteration_bounds = array<i64: 1, 1>, scalar_prefetch = 0 : i64, scratch_operands = 0 : i64, tpu.core_type = #tpu.core_type<tc>, window_params = [{transform_indices = @transform_0, window_bounds = array<i64: 8, 32>}, {transform_indices = @transform_1, window_bounds = array<i64: 8, 32>}, {pipeline_mode = #tpu.pipeline_mode<synchronous>, transform_indices = @transform_2, window_bounds = array<i64: 8, 1>}, {transform_indices = @transform_3, window_bounds = array<i64: 1, 1, 1>}]} {
    %c0_i32 = arith.constant 0 : i32
    %0 = arith.cmpi eq, %arg1, %c0_i32 : i32
    %1 = arith.extui %0 : i1 to i32
    %c0_i32_0 = arith.constant 0 : i32
    %2 = arith.cmpi ne, %1, %c0_i32_0 : i32
    scf.if %2 {
      %cst_20 = arith.constant 0.000000e+00 : f32
      %42 = vector.broadcast %cst_20 : f32 to vector<1x1x1xf32>
      %c0_21 = arith.constant 0 : index
      %c0_22 = arith.constant 0 : index
      %c0_23 = arith.constant 0 : index
      %43 = vector.load %arg5[%c0_21, %c0_22, %c0_23] : memref<1x1x1xf32, #tpu.memory_space<vmem>>, vector<1x1x1xf32>
      tpu.vector_store %arg5[%c0_21, %c0_22, %c0_23], %42 {strides = array<i32>} : memref<1x1x1xf32, #tpu.memory_space<vmem>>, vector<1x1x1xf32>,
    } else {
    }
    %c0 = arith.constant 0 : index
    %c0_1 = arith.constant 0 : index
    %3 = vector.load %arg2[%c0, %c0_1] : memref<8x32xf32, #tpu.memory_space<vmem>>, vector<8x32xf32>
    %c0_2 = arith.constant 0 : index
    %c0_3 = arith.constant 0 : index
    %4 = vector.load %arg3[%c0_2, %c0_3] : memref<8x32xf32, #tpu.memory_space<vmem>>, vector<8x32xf32>
    %5 = arith.mulf %3, %4 : vector<8x32xf32>
    %cst = arith.constant dense<0.000000e+00> : vector<8xf32>
    %6 = vector.multi_reduction <add>, %5, %cst [1] : vector<8x32xf32> to vector<8xf32>
    %7 = vector.shape_cast %6 : vector<8xf32> to vector<8x1xf32>
    %8 = arith.mulf %3, %3 : vector<8x32xf32>
    %cst_4 = arith.constant dense<0.000000e+00> : vector<8xf32>
    %9 = vector.multi_reduction <add>, %8, %cst_4 [1] : vector<8x32xf32> to vector<8xf32>
    %10 = vector.shape_cast %9 : vector<8xf32> to vector<8x1xf32>
    %11 = arith.mulf %4, %4 : vector<8x32xf32>
    %cst_5 = arith.constant dense<0.000000e+00> : vector<8xf32>
    %12 = vector.multi_reduction <add>, %11, %cst_5 [1] : vector<8x32xf32> to vector<8xf32>
    %13 = vector.shape_cast %12 : vector<8xf32> to vector<8x1xf32>
    %14 = arith.mulf %10, %13 : vector<8x1xf32>
    %cst_6 = arith.constant 1.000000e-16 : f32
    %15 = vector.broadcast %cst_6 : f32 to vector<8x1xf32>
    %16 = arith.maximumf %14, %15 : vector<8x1xf32>
    %17 = math.rsqrt %16 : vector<8x1xf32>
    %18 = arith.mulf %7, %17 : vector<8x1xf32>
    %cst_7 = arith.constant 1.000000e+00 : f32
    %19 = vector.broadcast %cst_7 : f32 to vector<8x1xf32>
    %20 = arith.subf %19, %18 : vector<8x1xf32>
    %c0_8 = arith.constant 0 : index
    %c0_9 = arith.constant 0 : index
    %21 = vector.load %arg4[%c0_8, %c0_9] : memref<8x1xf32, #tpu.memory_space<vmem>>, vector<8x1xf32>
    %cst_10 = arith.constant 1.000000e+00 : f32
    %22 = vector.broadcast %cst_10 : f32 to vector<8x1xf32>
    %23 = arith.subf %22, %21 : vector<8x1xf32>
    %24 = arith.mulf %23, %20 : vector<8x1xf32>
    %25 = arith.mulf %24, %20 : vector<8x1xf32>
    %cst_11 = arith.constant 2.000000e+00 : f32
    %26 = vector.broadcast %cst_11 : f32 to vector<8x1xf32>
    %27 = arith.subf %26, %20 : vector<8x1xf32>
    %cst_12 = arith.constant 0.000000e+00 : f32
    %28 = vector.broadcast %cst_12 : f32 to vector<8x1xf32>
    %29 = arith.maximumf %27, %28 : vector<8x1xf32>
    %30 = arith.mulf %21, %29 : vector<8x1xf32>
    %31 = arith.mulf %30, %29 : vector<8x1xf32>
    %32 = arith.mulf %31, %29 : vector<8x1xf32>
    %33 = arith.addf %25, %32 : vector<8x1xf32>
    %c0_13 = arith.constant 0 : index
    %c0_14 = arith.constant 0 : index
    %c0_15 = arith.constant 0 : index
    %34 = vector.load %arg5[%c0_13, %c0_14, %c0_15] : memref<1x1x1xf32, #tpu.memory_space<vmem>>, vector<1x1x1xf32>
    %35 = vector.shape_cast %33 : vector<8x1xf32> to vector<1x8x1xf32>
    %cst_16 = arith.constant dense<0.000000e+00> : vector<1xf32>
    %36 = vector.multi_reduction <add>, %35, %cst_16 [1, 2] : vector<1x8x1xf32> to vector<1xf32>
    %37 = vector.shape_cast %36 : vector<1xf32> to vector<1x1x1xf32>
    %38 = vector.extract %37[0, 0, 0] : f32 from vector<1x1x1xf32>
    %39 = vector.broadcast %38 : f32 to vector<1x1x1xf32>
    %40 = arith.addf %34, %39 : vector<1x1x1xf32>
    %c0_17 = arith.constant 0 : index
    %c0_18 = arith.constant 0 : index
    %c0_19 = arith.constant 0 : index
    %41 = vector.load %arg5[%c0_17, %c0_18, %c0_19] : memref<1x1x1xf32, #tpu.memory_space<vmem>>, vector<1x1x1xf32>
    tpu.vector_store %arg5[%c0_17, %c0_18, %c0_19], %40 {strides = array<i32>} : memref<1x1x1xf32, #tpu.memory_space<vmem>>, vector<1x1x1xf32>,
    return
  }
  func.func @transform_0(%arg0: i32, %arg1: i32) -> (i32, i32) {
    %c1_i32 = arith.constant 1 : i32
    %0 = arith.muli %arg0, %c1_i32 : i32
    %1 = arith.addi %0, %arg1 : i32
    %c0_i32 = arith.constant 0 : i32
    %2 = arith.minsi %1, %c0_i32 : i32
    %c0_i32_0 = arith.constant 0 : i32
    %c0_i32_1 = arith.constant 0 : i32
    return %2, %c0_i32_0 : i32, i32
  }
  func.func @transform_1(%arg0: i32, %arg1: i32) -> (i32, i32) {
    %c1_i32 = arith.constant 1 : i32
    %0 = arith.muli %arg0, %c1_i32 : i32
    %1 = arith.addi %0, %arg1 : i32
    %c0_i32 = arith.constant 0 : i32
    %2 = arith.minsi %1, %c0_i32 : i32
    %c0_i32_0 = arith.constant 0 : i32
    %c0_i32_1 = arith.constant 0 : i32
    return %2, %c0_i32_0 : i32, i32
  }
  func.func @transform_2(%arg0: i32, %arg1: i32) -> (i32, i32) {
    %c0_i32 = arith.constant 0 : i32
    %c0_i32_0 = arith.constant 0 : i32
    %c0_i32_1 = arith.constant 0 : i32
    return %c0_i32, %c0_i32_0 : i32, i32
  }
  func.func @transform_3(%arg0: i32, %arg1: i32) -> (i32, i32, i32) {
    %c0_i32 = arith.constant 0 : i32
    %c0_i32_0 = arith.constant 0 : i32
    %c0_i32_1 = arith.constant 0 : i32
    return %arg0, %c0_i32, %c0_i32_0 : i32, i32, i32
  }
}

</mosaic_0001>

<bundles_post_ra>
// kernel: tpu_custom_call.1
= control target key start
LH: loop header
LB: loop body
LE: loop exit
PB: predicated region body
PF: predicated region fallthrough
CT: control target
= control target key end

     0   :  { %8 = vsyncpa [#allocation3], 0  ;;  %s225_s0 = inlined_call_operand.vmem [shape: f32[8,32], index: 0, kind: input, shape index: {}]   ;;  %s226_s1 = inlined_call_operand.hbm [shape: f32[8,32], index: 1, kind: input, shape index: {}]   ;;  %s227_s2 = inlined_call_operand.vmem [shape: f32[8,1], index: 2, kind: input, shape index: {}]   ;;  %s228_s3 = inlined_call_operand.hbm [shape: f32[1,1,1], index: 3, kind: output, shape index: {}]  }
   0x1   :  { %9 = vsyncpa [#allocation4], 0  ;;  %s188_s12 = smov [#allocation2]  }
   0x2   :  { %s33_s13 = sshll.u32 %s188_s12, 4  ;;  %s34_s13 = int_to_ptr.vmem [resolvable:$true] %s33_s13 }
   0x3   :  { %s152_s14 = scalar_lea.vmem %s34_s13, 128  ;;  %p157_p1 = scmp.lt.s32.totalorder %s34_s13, %s34_s13 }
   0x4   :  { %p153_p0 = scmp.ne.s32.totalorder %s34_s13, %s152_s14  ;;  %p158_p2 = scmp.lt.s32.totalorder %s152_s14, %s152_s14 }
   0x6   :  { %p159_p3 = por %p158_p2, %p157_p1 }
   0x8   :  { %p160_p4 = pnand %p159_p3, %p153_p0 }
   0xa   :  { %163 = shalt.err (!%p160_p4)
}
   0xb   :  { %36 = dma.hbm_to_vmem [thread:$0]  %s226_s1, 128, %s34_s13, [#allocation3]  }
   0xc   :  { %184 = dma.done.wait [#allocation3], 128  }
   0xd   :  { %185 = vsyncadd [#allocation3], 4294967168  ;;  %vm66_vm0 = vcmask 0   ;;  %v189_v0 = vmov 0.0   ;;  %v68_v1 = vld [vmem:[%s225_s0] sm:$0xff]  ;;  %vm71_vm1 = vcmask 261120  }
   0xe   :  { %67 = vst.msk [vmem:[#allocation5] sm:$0x1] %vm66_vm0, %v189_v0  ;;  %v69_v2 = vld [vmem:[#allocation2] sm:$0xff]  ;;  %v75_v3 = vmul.f32 %v68_v1, %v68_v1  ;;  %vm99_vm2 = vcmask 7168  }
   0xf   :  { %v79_v4 = vmul.f32 %v69_v2, %v69_v2  ;;  %v70_v5 = vmul.f32 %v69_v2, %v68_v1  ;;  %v88_v16 = vld [vmem:[%s227_s2] sm:$0xff]  ;;  %s190_s2 = smov [#allocation5]  }
  0x10   :  { %v76_v6 = vsel %vm71_vm1, %v75_v3, 0.0  ;;  %v89_v18 = vsub.f32 1.0, %v88_v16  ;;  %s120_s19 = sshll.u32 %s190_s2, 4  ;;  %s121_s19 = int_to_ptr.vmem [resolvable:$true] %s120_s19 }
  0x11   :  { %v72_v7 = vsel %vm71_vm1, %v70_v5, 0.0  ;;  %77 = vadd.xlane.f32.xlu0 %v76_v6  ;;  %v80_v8 = vsel %vm71_vm1, %v79_v4, 0.0  ;;  %s164_s21 = scalar_lea.vmem %s121_s19, 16  ;;  %s168_s22 = scalar_lea.vmem %s121_s19, 32 }
  0x12   :  { %73 = vadd.xlane.f32.xlu1 %v72_v7  ;;  %p165_p5 = scmp.ne.s32.totalorder %s121_s19, %s164_s21  ;;  %p169_p6 = scmp.lt.s32.totalorder %s121_s19, %s121_s19 }
  0x13   :  { %p170_p7 = scmp.lt.s32.totalorder %s168_s22, %s164_s21 }
  0x15   :  { %81 = vadd.xlane.f32.xlu0 %v80_v8  ;;  %v98_v35 = vld [vmem:[#allocation5] sm:$0x1]  ;;  %p171_p8 = por %p170_p7, %p169_p6 }
  0x17   :  { %p172_p9 = pnand %p171_p8, %p165_p5 }
  0x9a   :  { %v78_v9 = vpop.xlane.xlu0 %77 }
  0x9b   :  { %v74_v13 = vpop.xlane.xlu1 %73 }
  0x9e   :  { %v82_v10 = vpop.xlane.xlu0 %81 }
  0x9f   :  { %v83_v11 = vmul.f32 %v82_v10, %v78_v9 }
  0xa1   :  { %v84_v12 = vmax.f32 %v83_v11, 1e-16 }
  0xa3   :  { %142 = vrsqrt.f32 %v84_v12 }
  0xb0   :  { %v143_v14 = vpop.eup %142 }
  0xb1   :  { %v86_v15 = vmul.f32 %v143_v14, %v74_v13 }
  0xb3   :  { %v87_v17 = vsub.f32 1.0, %v86_v15 }
  0xb5   :  { %v92_v19 = vsub.f32 2.0, %v87_v17  ;;  %v90_v21 = vmul.f32 %v89_v18, %v87_v17 }
  0xb7   :  { %v93_v20 = vmax.f32 %v92_v19, 0.0  ;;  %v91_v24 = vmul.f32 %v90_v21, %v87_v17 }
  0xb9   :  { %v94_v22 = vmul.f32 %v93_v20, %v88_v16 }
  0xbb   :  { %v95_v23 = vmul.f32 %v94_v22, %v93_v20 }
  0xbd   :  { %v96_v25 = vmul.f32 %v95_v23, %v93_v20 }
  0xbf   :  { %v97_v26 = vadd.f32 %v96_v25, %v91_v24 }
  0xc1   :  { %v100_v27 = vsel %vm99_vm2, %v97_v26, 0.0 }
  0xc2   :  { %101 = vadd.xlane.f32.xlu1 %v100_v27 }
 0x14b   :  { %v102_v28 = vpop.xlane.xlu1 %101 }
 0x14c   :  { %v103_v29 = vrot.slane %v102_v28, 4 }
 0x14e   :  { %v104_v30 = vadd.f32 %v103_v29, %v102_v28 }
 0x150   :  { %v105_v31 = vrot.slane %v104_v30, 2 }
 0x152   :  { %v106_v32 = vadd.f32 %v105_v31, %v104_v30 }
 0x154   :  { %v107_v33 = vrot.slane %v106_v32, 1 }
 0x156   :  { %v108_v34 = vadd.f32 %v107_v33, %v106_v32 }
 0x158   :  { %137 = vpush %v108_v34 }
 0x189   :  { %s138_s20 = spop %137 }
 0x18a   :  { %v110_v36 = vstv %s138_s20 }
 0x18b   :  { %v111_v37 = vadd.f32 %v110_v36, %v98_v35 }
 0x18d   :  { %113 = vst.msk [vmem:[#allocation5] sm:$0x1] %vm66_vm0, %v111_v37 }
 0x18e   :  { %175 = shalt.err (!%p172_p9)
}
 0x18f   :  { %123 = dma.vmem_to_hbm [thread:$0]  %s121_s19, 16, %s228_s3, [#allocation4]  }
 0x190   :  { %186 = dma.done.wait [#allocation4], 16  }
 0x191   :  { %187 = vsyncadd [#allocation4], 4294967280 }
 0x192   :  { %127 = vsyncpa [#allocation3], 1 }
 0x193   :  { %128 = vsyncpa [#allocation4], 1 }

</bundles_post_ra>
